<compile_context>
chip_gen: v6e
topology: v6e:2x2x1
jax: 0.10.0
libtpu: 0.0.40
codegen_flags: <defaults>
</compile_context>

<pallas_src>
import jax
import jax.numpy as jnp
from jax.experimental import pallas as pl
from jax.experimental.pallas import tpu as pltpu


def _round_up(a: int, b: int) -> int:
    return (a + b - 1) // b * b


def _pack_factor(d_in: int, d_att: int) -> int:
    """How many logical rows to pack into one 128-lane physical row."""
    d = max(d_in, d_att, 1)
    if d >= 128:
        return 1
    return max(1, 128 // d)


def _attention_kernel(x_ref, w1_ref, b1_ref, w2_ref, out_ref):
    # x_ref:  (tile_p, P*D_in)    packed row tile, VMEM
    # w1_ref: (P*D_in, P*D_att)   block-diagonal attention weight, resident
    # b1_ref: (1, P*D_att)        tiled bias, resident
    # w2_ref: (P*D_att, P)        block context weight, resident
    # out_ref: (tile_p, P)
    x = x_ref[...]

    # attention_layer + tanh (MXU matmul, f32 accumulation, dense 128 lanes)
    scores = jnp.dot(
        x, w1_ref[...],
        preferred_element_type=jnp.float32,
        precision=jax.lax.Precision.HIGHEST,
    )
    scores = jnp.tanh(scores + b1_ref[...])

    # context_layer: ride the idle MXU instead of VPU-mul + XLU lane-reduce.
    # Yields one logit per packed row slot: (tile_p, P).
    weights = jnp.dot(
        scores, w2_ref[...],
        preferred_element_type=jnp.float32,
        precision=jax.lax.Precision.HIGHEST,
    )

    # softmax over the (logical) last dim of size 1: result is 1.0 for any
    # finite logit; NaN propagates. tanh bounds scores, so logits are never
    # +/-Inf and this is exactly equivalent to exp/sum.  (Revert to a real
    # softmax if this kernel is ever generalized to >1 logit.)
    out_ref[...] = (weights - weights + 1.0).astype(out_ref.dtype)


def attention_forward(x, w1, b1, w2, *, tile_n: int = 16384):
    """x: (B, S, input_dim) float32.  PyTorch-shaped params:
       w1: (attention_dim, input_dim)  attention_layer.weight
       b1: (attention_dim,)            attention_layer.bias
       w2: (1, attention_dim)          context_layer.weight
       Returns (B, S, 1) float32."""
    B, S, D_in = x.shape
    D_att = w1.shape[0]
    assert w1.shape == (D_att, D_in)
    assert b1.shape == (D_att,)
    assert w2.shape == (1, D_att)

    N = B * S
    P = _pack_factor(D_in, D_att)

    # --- row tiling (in packed rows) -------------------------------------
    rows_packed = pl.cdiv(N, P)
    tile_p = min(max(tile_n // P, 8), _round_up(rows_packed, 8))
    tile_p = _round_up(tile_p, 8)              # sublane rule
    np_pad = _round_up(rows_packed, tile_p)    # whole number of tiles
    n_pad = np_pad * P
    num_tiles = np_pad // tile_p

    # --- input packing (wrapper-side glue, contiguous reshape) ------------
    x2d = x.reshape(N, D_in).astype(jnp.float32)
    if n_pad != N:
        x2d = jnp.pad(x2d, ((0, n_pad - N), (0, 0)))
    x_packed = x2d.reshape(np_pad, P * D_in)   # 4 rows per 128-lane row

    # --- packed parameters -------------------------------------------------
    w1_t = jnp.transpose(w1).astype(jnp.float32)           # (D_in, D_att)
    eye_p = jnp.eye(P, dtype=jnp.float32)
    # block-diagonal: group q of input lanes -> group q of score lanes
    w1_block = jnp.einsum("pq,ia->piqa", eye_p, w1_t).reshape(
        P * D_in, P * D_att)                                # (P*D_in, P*D_att)
    b1_block = jnp.tile(b1.astype(jnp.float32), (P,)).reshape(1, P * D_att)
    # context weight: column q carries w2 over score-lane group q
    w2_block = jnp.einsum("pq,a->paq", eye_p,
                          w2[0].astype(jnp.float32)).reshape(P * D_att, P)

    itemsize = 4
    cost = pl.CostEstimate(
        flops=2 * np_pad * (P * D_in) * (P * D_att)     # first matmul
        + np_pad * (P * D_att)                          # bias add
        + 2 * np_pad * (P * D_att) * P                  # context matmul
        + 2 * np_pad * P,                               # softmax shortcut
        transcendentals=np_pad * (P * D_att),           # tanh
        bytes_accessed=(np_pad * P * D_in + np_pad * P) * itemsize
        + (P * D_in * P * D_att + P * D_att + P * D_att * P) * itemsize,
    )

    out_packed = pl.pallas_call(
        _attention_kernel,
        out_shape=jax.ShapeDtypeStruct((np_pad, P), jnp.float32),
        grid=(num_tiles,),
        in_specs=[
            pl.BlockSpec((tile_p, P * D_in), lambda i: (i, 0)),    # x: tiled
            pl.BlockSpec((P * D_in, P * D_att), lambda i: (0, 0)),  # resident
            pl.BlockSpec((1, P * D_att), lambda i: (0, 0)),          # resident
            pl.BlockSpec((P * D_att, P), lambda i: (0, 0)),          # resident
        ],
        out_specs=pl.BlockSpec((tile_p, P), lambda i: (i, 0)),
        compiler_params=pltpu.CompilerParams(
            dimension_semantics=("parallel",),
        ),
        cost_estimate=cost,
    )(x_packed, w1_block, b1_block, w2_block)

    # unpack: (np_pad, P) row-major == (n_pad, 1) in original row order
    return out_packed.reshape(n_pad, 1)[:N].reshape(B, S, 1)


if __name__ == "__main__":
    # Small shapes consistent with the module: batch=2, seq=8, input_dim=32,
    # attention_dim=32.
    B, S, D_in, D_att = 2, 8, 32, 32

    key = jax.random.PRNGKey(0)
    k_x, k_w1, k_b1, k_w2 = jax.random.split(key, 4)

    x = jax.random.normal(k_x, (B, S, D_in), dtype=jnp.float32)
    # Deterministic synthetic parameters (PyTorch Linear shapes):
    w1 = jax.random.normal(k_w1, (D_att, D_in), dtype=jnp.float32) * 0.1   # attention_layer.weight
    b1 = jax.random.normal(k_b1, (D_att,), dtype=jnp.float32) * 0.1        # attention_layer.bias
    w2 = jax.random.normal(k_w2, (1, D_att), dtype=jnp.float32) * 0.1      # context_layer.weight

    out = attention_forward(x, w1, b1, w2)
    out = jax.block_until_ready(out)

    # Reference check in plain JAX (same math as the PyTorch forward).
    scores_ref = jnp.tanh(jnp.einsum("bsd,ad->bsa", x, w1) + b1)
    weights_ref = jnp.einsum("bsa,oa->bso", scores_ref, w2)
    ref = jax.nn.softmax(weights_ref, axis=-1)

    assert out.shape == (B, S, 1), out.shape
    assert jnp.allclose(out, ref, atol=1e-5, rtol=1e-5), (
        float(jnp.max(jnp.abs(out - ref)))
    )
    print("KERNEL_OK")
</pallas_src>

<mosaic_0001>
module attributes {stable_mosaic.version = 11 : i64} {
  func.func @_attention_kernel(%arg0: i32, %arg1: memref<8x128xf32, #tpu.memory_space<vmem>>, %arg2: memref<128x128xf32, #tpu.memory_space<vmem>>, %arg3: memref<1x128xf32, #tpu.memory_space<vmem>>, %arg4: memref<128x4xf32, #tpu.memory_space<vmem>>, %arg5: memref<8x4xf32, #tpu.memory_space<vmem>>) attributes {dimension_semantics = [#tpu.dimension_semantics<parallel>], iteration_bounds = array<i64: 1>, scalar_prefetch = 0 : i64, scratch_operands = 0 : i64, tpu.core_type = #tpu.core_type<tc>, window_params = [{transform_indices = @transform_0, window_bounds = array<i64: 8, 128>}, {pipeline_mode = #tpu.pipeline_mode<synchronous>, transform_indices = @transform_1, window_bounds = array<i64: 128, 128>}, {pipeline_mode = #tpu.pipeline_mode<synchronous>, transform_indices = @transform_2, window_bounds = array<i64: 1, 128>}, {pipeline_mode = #tpu.pipeline_mode<synchronous>, transform_indices = @transform_3, window_bounds = array<i64: 128, 4>}, {transform_indices = @transform_4, window_bounds = array<i64: 8, 4>}]} {
    %c0 = arith.constant 0 : index
    %c0_0 = arith.constant 0 : index
    %0 = vector.load %arg1[%c0, %c0_0] : memref<8x128xf32, #tpu.memory_space<vmem>>, vector<8x128xf32>
    %c0_1 = arith.constant 0 : index
    %c0_2 = arith.constant 0 : index
    %1 = vector.load %arg2[%c0_1, %c0_2] : memref<128x128xf32, #tpu.memory_space<vmem>>, vector<128x128xf32>
    %cst = arith.constant dense<0.000000e+00> : vector<8x128xf32>
    %2 = tpu.matmul %0, %1, %cst {dimension_numbers = #tpu.dot_dimension_numbers<[1], [0], [0], [1], [0, 0, 1, 1], [], []>, precision = #tpu.contract_precision<fp32>} : vector<8x128xf32>, vector<128x128xf32>, vector<8x128xf32> -> vector<8x128xf32>
    %c0_3 = arith.constant 0 : index
    %c0_4 = arith.constant 0 : index
    %3 = vector.load %arg3[%c0_3, %c0_4] : memref<1x128xf32, #tpu.memory_space<vmem>>, vector<1x128xf32>
    %4 = vector.broadcast %3 : vector<1x128xf32> to vector<8x128xf32>
    %5 = arith.addf %2, %4 : vector<8x128xf32>
    %6 = math.tanh %5 : vector<8x128xf32>
    %c0_5 = arith.constant 0 : index
    %c0_6 = arith.constant 0 : index
    %7 = vector.load %arg4[%c0_5, %c0_6] : memref<128x4xf32, #tpu.memory_space<vmem>>, vector<128x4xf32>
    %cst_7 = arith.constant dense<0.000000e+00> : vector<8x4xf32>
    %8 = tpu.matmul %6, %7, %cst_7 {dimension_numbers = #tpu.dot_dimension_numbers<[1], [0], [0], [1], [0, 0, 1, 1], [], []>, precision = #tpu.contract_precision<fp32>} : vector<8x128xf32>, vector<128x4xf32>, vector<8x4xf32> -> vector<8x4xf32>
    %9 = arith.subf %8, %8 : vector<8x4xf32>
    %cst_8 = arith.constant 1.000000e+00 : f32
    %10 = vector.broadcast %cst_8 : f32 to vector<8x4xf32>
    %11 = arith.addf %9, %10 : vector<8x4xf32>
    %c0_9 = arith.constant 0 : index
    %c0_10 = arith.constant 0 : index
    %12 = vector.load %arg5[%c0_9, %c0_10] : memref<8x4xf32, #tpu.memory_space<vmem>>, vector<8x4xf32>
    tpu.vector_store %arg5[%c0_9, %c0_10], %11 {strides = array<i32>} : memref<8x4xf32, #tpu.memory_space<vmem>>, vector<8x4xf32>,
    return
  }
  func.func @transform_0(%arg0: i32) -> (i32, i32) {
    %c0_i32 = arith.constant 0 : i32
    %c0_i32_0 = arith.constant 0 : i32
    return %arg0, %c0_i32 : i32, i32
  }
  func.func @transform_1(%arg0: i32) -> (i32, i32) {
    %c0_i32 = arith.constant 0 : i32
    %c0_i32_0 = arith.constant 0 : i32
    %c0_i32_1 = arith.constant 0 : i32
    return %c0_i32, %c0_i32_0 : i32, i32
  }
  func.func @transform_2(%arg0: i32) -> (i32, i32) {
    %c0_i32 = arith.constant 0 : i32
    %c0_i32_0 = arith.constant 0 : i32
    %c0_i32_1 = arith.constant 0 : i32
    return %c0_i32, %c0_i32_0 : i32, i32
  }
  func.func @transform_3(%arg0: i32) -> (i32, i32) {
    %c0_i32 = arith.constant 0 : i32
    %c0_i32_0 = arith.constant 0 : i32
    %c0_i32_1 = arith.constant 0 : i32
    return %c0_i32, %c0_i32_0 : i32, i32
  }
  func.func @transform_4(%arg0: i32) -> (i32, i32) {
    %c0_i32 = arith.constant 0 : i32
    %c0_i32_0 = arith.constant 0 : i32
    return %arg0, %c0_i32 : i32, i32
  }
}

</mosaic_0001>

<bundles_post_ra>
// kernel: tpu_custom_call.1
= control target key start
LH: loop header
LB: loop body
LE: loop exit
PB: predicated region body
PF: predicated region fallthrough
CT: control target
= control target key end

     0   :  { %9 = vsyncpa [#allocation3], 0  ;;  %s2013_s15 = smov [#allocation2]   ;;  %s2868_s0 = inlined_call_operand.hbm [shape: f32[8,128], index: 0, kind: input, shape index: {}]   ;;  %s2869_s1 = inlined_call_operand.vmem [shape: f32[128,128], index: 1, kind: input, shape index: {}]   ;;  %s2870_s2 = inlined_call_operand.vmem [shape: f32[1,128], index: 2, kind: input, shape index: {}]   ;;  %s2871_s3 = inlined_call_operand.vmem [shape: f32[128,4], index: 3, kind: input, shape index: {}]   ;;  %s2872_s4 = inlined_call_operand.vmem [shape: f32[8,4], index: 4, kind: output, shape index: {}]  }
   0x1   :  { %s16_s16 = sshll.u32 %s2013_s15, 4  ;;  %s17_s16 = int_to_ptr.vmem [resolvable:$true] %s16_s16 }
   0x2   :  { %s1999_s17 = scalar_lea.vmem %s17_s16, 128  ;;  %p2004_p1 = scmp.lt.s32.totalorder %s17_s16, %s17_s16 }
   0x3   :  { %p2000_p0 = scmp.ne.s32.totalorder %s17_s16, %s1999_s17  ;;  %p2005_p2 = scmp.lt.s32.totalorder %s1999_s17, %s1999_s17 }
   0x5   :  { %p2006_p3 = por %p2005_p2, %p2004_p1 }
   0x7   :  { %p2007_p4 = pnand %p2006_p3, %p2000_p0 }
   0x9   :  { %2010 = shalt.err (!%p2007_p4)
}
   0xa   :  { %19 = dma.hbm_to_vmem [thread:$0]  %s2868_s0, 128, %s17_s16, [#allocation3]  }
   0xb   :  { %2011 = dma.done.wait [#allocation3], 128  }
   0xc   :  { %2012 = vsyncadd [#allocation3], 4294967168  ;;  %v2014_v0 = vmov 0.0   ;;  %vm2015_vm0 = vmmov 0   ;;  %v45_v1 = vld [vmem:[%s2869_s1 + $0x78] sm:$0xff]  ;;  %v44_v2 = vld [vmem:[%s2869_s1 + $0x70] sm:$0xff] }
   0xd   :  { %1566 = vmatprep.subr.mxu0 %v2014_v0  ;;  %1601 = vmatprep.subr.mxu1 %v2014_v0  ;;  %v43_v3 = vld [vmem:[%s2869_s1 + $0x68] sm:$0xff]  ;;  %v2059_v4 = vand.u32 4294901760, %v45_v1  ;;  %v2061_v5 = vand.u32 4294901760, %v44_v2  ;;  %v42_v7 = vld [vmem:[%s2869_s1 + $0x60] sm:$0xff]  ;;  %v41_v8 = vld [vmem:[%s2869_s1 + $0x58] sm:$0xff]  ;;  %vm1354_vm1 = vcmask 31744  }
   0xe   :  { %1598 = vmatprep.mubr.msk.f32.mxu0 %vm2015_vm0, %v2014_v0  ;;  %1633 = vmatprep.mubr.msk.f32.mxu1 %vm2015_vm0, %v2014_v0  ;;  %v2063_v6 = vand.u32 4294901760, %v43_v3  ;;  %v40_v9 = vld [vmem:[%s2869_s1 + $0x50] sm:$0xff]  ;;  %v2074_v10 = vand.u32 4294901760, %v42_v7  ;;  %v2076_v11 = vand.u32 4294901760, %v41_v8  ;;  %v39_v13 = vld [vmem:[%s2869_s1 + $0x48] sm:$0xff]  ;;  %v38_v14 = vld [vmem:[%s2869_s1 + $0x40] sm:$0xff] }
   0xf   :  { %v2078_v12 = vand.u32 4294901760, %v40_v9  ;;  %1567 = vmatpush3.msra.mxu0 %v2059_v4  ;;  %v2088_v15 = vsub.f32 %v45_v1, %v2059_v4  ;;  %v2091_v16 = vsub.f32 %v44_v2, %v2061_v5  ;;  %v2093_v17 = vand.u32 4294901760, %v39_v13  ;;  %v37_v19 = vld [vmem:[%s2869_s1 + $0x38] sm:$0xff]  ;;  %v36_v26 = vld [vmem:[%s2869_s1 + $0x30] sm:$0xff]  ;;  %v35_v36 = vld [vmem:[%s2869_s1 + $0x28] sm:$0xff] }
  0x10   :  { %v2096_v18 = vsub.f32 %v43_v3, %v2063_v6  ;;  %1568 = vmatprep.subr.mxu0 %v2014_v0  ;;  %v2103_v20 = vsub.f32 %v42_v7, %v2074_v10  ;;  %v2106_v21 = vsub.f32 %v41_v8, %v2076_v11  ;;  %v2112_v25 = vand.u32 4294901760, %v38_v14  ;;  %v34_v41 = vld [vmem:[%s2869_s1 + $0x20] sm:$0xff]  ;;  %v33_v49 = vld [vmem:[%s2869_s1 + $0x18] sm:$0xff]  ;;  %v32_v54 = vld [vmem:[%s2869_s1 + $0x10] sm:$0xff] }
  0x11   :  { %1569 = vmatpush3.msra.mxu0 %v2061_v5  ;;  %v147_v22 = vand.u32 4294901760, %v2088_v15  ;;  %v154_v23 = vand.u32 4294901760, %v2091_v16  ;;  %v2119_v28 = vand.u32 4294901760, %v37_v19  ;;  %v2123_v30 = vsub.f32 %v40_v9, %v2078_v12  ;;  %v29_v50 = vld [vmem:[#allocation2] sm:$0xff]  ;;  %v31_v60 = vld [vmem:[%s2869_s1 + $0x8] sm:$0xff] }
  0x12   :  { %v161_v24 = vand.u32 4294901760, %v2096_v18  ;;  %1570 = vmatprep.subr.mxu0 %v2014_v0  ;;  %v168_v27 = vand.u32 4294901760, %v2103_v20  ;;  %v175_v29 = vand.u32 4294901760, %v2106_v21  ;;  %v2136_v34 = vsub.f32 %v39_v13, %v2093_v17  ;;  %v30_v7 = vld [vmem:[%s2869_s1] sm:$0xff] }
  0x13   :  { %1571 = vmatpush3.msra.mxu0 %v2063_v6  ;;  %v148_v31 = vsub.f32 %v2088_v15, %v147_v22  ;;  %v155_v32 = vsub.f32 %v2091_v16, %v154_v23  ;;  %v2139_v35 = vand.u32 4294901760, %v36_v26  ;;  %v182_v40 = vand.u32 4294901760, %v2123_v30 }
  0x14   :  { %v162_v33 = vsub.f32 %v2096_v18, %v161_v24  ;;  %1572 = vmatprep.subr.mxu0 %v2014_v0  ;;  %v169_v39 = vsub.f32 %v2103_v20, %v168_v27  ;;  %v176_v42 = vsub.f32 %v2106_v21, %v175_v29  ;;  %v2157_v43 = vsub.f32 %v38_v14, %v2112_v25 }
  0x15   :  { %1573 = vmatpush3.msra.mxu0 %v2074_v10  ;;  %v149_v37 = vand.u32 4294901760, %v148_v31  ;;  %v156_v38 = vand.u32 4294901760, %v155_v32  ;;  %v2160_v45 = vand.u32 4294901760, %v35_v36  ;;  %v189_v46 = vand.u32 4294901760, %v2136_v34 }
  0x16   :  { %1574 = vmatprep.subr.mxu0 %v2014_v0  ;;  %v163_v44 = vand.u32 4294901760, %v162_v33  ;;  %v2164_v47 = vsub.f32 %v37_v19, %v2119_v28  ;;  %v2168_v48 = vand.u32 4294901760, %v34_v41  ;;  %v170_v51 = vand.u32 4294901760, %v169_v39 }
  0x17   :  { %1575 = vmatpush3.msra.mxu0 %v2076_v11  ;;  %1602 = vmatpush3.msra.mxu1 %v149_v37  ;;  %v183_v52 = vsub.f32 %v2123_v30, %v182_v40  ;;  %v196_v53 = vand.u32 4294901760, %v2157_v43  ;;  %v2182_v55 = vsub.f32 %v36_v26, %v2139_v35  ;;  %v177_v56 = vand.u32 4294901760, %v176_v42 }
  0x18   :  { %1576 = vmatprep.subr.mxu0 %v2014_v0  ;;  %1603 = vmatprep.subr.mxu1 %v2014_v0  ;;  %v203_v57 = vand.u32 4294901760, %v2164_v47  ;;  %v190_v58 = vsub.f32 %v2136_v34, %v189_v46  ;;  %v2191_v59 = vand.u32 4294901760, %v33_v49  ;;  %v2197_v61 = vsub.f32 %v35_v36, %v2160_v45 }
  0x19   :  { %1577 = vmatpush3.msra.mxu0 %v2078_v12  ;;  %1604 = vmatpush3.msra.mxu1 %v156_v38  ;;  %v2199_v62 = vand.u32 4294901760, %v29_v50  ;;  %v2203_v63 = vand.u32 4294901760, %v32_v54  ;;  %v184_v1 = vand.u32 4294901760, %v183_v52  ;;  %v197_v2 = vsub.f32 %v2157_v43, %v196_v53 }
  0x1a   :  { %1578 = vmatprep.subr.mxu0 %v2014_v0  ;;  %1605 = vmatprep.subr.mxu1 %v2014_v0  ;;  %v210_v3 = vand.u32 4294901760, %v2182_v55  ;;  %v2214_v8 = vsub.f32 %v34_v41, %v2168_v48  ;;  %v204_v9 = vsub.f32 %v2164_v47, %v203_v57  ;;  %v2221_v13 = vand.u32 4294901760, %v31_v60 }
  0x1b   :  { %1579 = vmatpush3.msra.mxu0 %v2093_v17  ;;  %1606 = vmatpush3.msra.mxu1 %v163_v44  ;;  %v191_v14 = vand.u32 4294901760, %v190_v58  ;;  %v217_v19 = vand.u32 4294901760, %v2197_v61  ;;  %v2226_v26 = vsub.f32 %v29_v50, %v2199_v62  ;;  %v2229_v31 = vsub.f32 %v33_v49, %v2191_v59 }
  0x1c   :  { %1580 = vmatprep.subr.mxu0 %v2014_v0  ;;  %1607 = vmatprep.subr.mxu1 %v2014_v0  ;;  %v2233_v32 = vand.u32 4294901760, %v30_v7  ;;  %v198_v33 = vand.u32 4294901760, %v197_v2  ;;  %v211_v36 = vsub.f32 %v2182_v55, %v210_v3  ;;  %v224_v37 = vand.u32 4294901760, %v2214_v8 }
  0x1d   :  { %1581 = vmatpush3.msra.mxu0 %v2112_v25  ;;  %1608 = vmatpush3.msra.mxu1 %v170_v51  ;;  %v2241_v38 = vsub.f32 %v32_v54, %v2203_v63  ;;  %v205_v39 = vand.u32 4294901760, %v204_v9  ;;  %v218_v41 = vsub.f32 %v2197_v61, %v217_v19  ;;  %v136_v42 = vand.u32 4294901760, %v2226_v26 }
  0x1e   :  { %1582 = vmatprep.subr.mxu0 %v2014_v0  ;;  %1609 = vmatprep.subr.mxu1 %v2014_v0  ;;  %v231_v44 = vand.u32 4294901760, %v2229_v31  ;;  %v2252_v49 = vsub.f32 %v31_v60, %v2221_v13  ;;  %v212_v50 = vand.u32 4294901760, %v211_v36  ;;  %v225_v51 = vsub.f32 %v2214_v8, %v224_v37 }
  0x1f   :  { %1583 = vmatpush3.msra.mxu0 %v2119_v28  ;;  %1610 = vmatpush3.msra.mxu1 %v177_v56  ;;  %v238_v52 = vand.u32 4294901760, %v2241_v38  ;;  %v2262_v54 = vsub.f32 %v30_v7, %v2233_v32  ;;  %v219_v56 = vand.u32 4294901760, %v218_v41  ;;  %v137_v58 = vsub.f32 %v2226_v26, %v136_v42 }
  0x20   :  { %1584 = vmatprep.subr.mxu0 %v2014_v0  ;;  %1611 = vmatprep.subr.mxu1 %v2014_v0  ;;  %v232_v60 = vsub.f32 %v2229_v31, %v231_v44  ;;  %v226_v2 = vand.u32 4294901760, %v225_v51 }
  0x21   :  { %1585 = vmatpush3.msra.mxu0 %v2139_v35  ;;  %1612 = vmatpush3.msra.mxu1 %v184_v1  ;;  %v245_v1 = vand.u32 4294901760, %v2252_v49  ;;  %v239_v7 = vsub.f32 %v2241_v38, %v238_v52  ;;  %v252_v9 = vand.u32 4294901760, %v2262_v54 }
  0x22   :  { %1586 = vmatprep.subr.mxu0 %v2014_v0  ;;  %1613 = vmatprep.subr.mxu1 %v2014_v0 }
  0x23   :  { %1587 = vmatpush3.msra.mxu0 %v2160_v45  ;;  %1614 = vmatpush3.msra.mxu1 %v191_v14  ;;  %v138_v14 = vand.u32 4294901760, %v137_v58  ;;  %v246_v36 = vsub.f32 %v2252_v49, %v245_v1  ;;  %v253_v41 = vsub.f32 %v2262_v54, %v252_v9  ;;  %v700_v58 = vld [vmem:[%s2871_s3 + $0x28] sm:$0xff] }
  0x24   :  { %1588 = vmatprep.subr.mxu0 %v2014_v0  ;;  %1615 = vmatprep.subr.mxu1 %v2014_v0 }
  0x25   :  { %1589 = vmatpush3.msra.mxu0 %v2168_v48  ;;  %1616 = vmatpush3.msra.mxu1 %v198_v33  ;;  %v233_v33 = vand.u32 4294901760, %v232_v60  ;;  %v254_v51 = vand.u32 4294901760, %v253_v41 }
  0x26   :  { %1590 = vmatprep.subr.mxu0 %v2014_v0  ;;  %1617 = vmatprep.subr.mxu1 %v2014_v0 }
  0x27   :  { %1591 = vmatpush3.msra.mxu0 %v2191_v59  ;;  %1618 = vmatpush3.msra.mxu1 %v205_v39  ;;  %v240_v39 = vand.u32 4294901760, %v239_v7  ;;  %v2596_v7 = vand.u32 4294901760, %v700_v58 }
  0x28   :  { %1592 = vmatprep.subr.mxu0 %v2014_v0  ;;  %1619 = vmatprep.subr.mxu1 %v2014_v0 }
  0x29   :  { %1593 = vmatpush3.msra.mxu0 %v2203_v63  ;;  %1620 = vmatpush3.msra.mxu1 %v212_v50  ;;  %v247_v50 = vand.u32 4294901760, %v246_v36 }
  0x2a   :  { %1594 = vmatprep.subr.mxu0 %v2014_v0  ;;  %1621 = vmatprep.subr.mxu1 %v2014_v0 }
  0x2b   :  { %1595 = vmatpush3.msra.mxu0 %v2221_v13  ;;  %1622 = vmatpush3.msra.mxu1 %v219_v56 }
  0x2c   :  { %1596 = vmatprep.subr.mxu0 %v2014_v0  ;;  %1623 = vmatprep.subr.mxu1 %v2014_v0 }
  0x2d   :  { %1597 = vmatpush3.msra.mxu0 %v2233_v32  ;;  %1624 = vmatpush3.msra.mxu1 %v226_v2 }
  0x2e   :  { %1625 = vmatprep.subr.mxu1 %v2014_v0  ;;  %1636 = vmatprep.subr.mxu0 %v2014_v0 }
  0x2f   :  { %1599 = vmatmul.mubr.f32.vlgmr.msra.gmra.mxu0 %v138_v14  ;;  %1626 = vmatpush3.msra.mxu1 %v233_v33  ;;  %v699_v14 = vld [vmem:[%s2871_s3 + $0x20] sm:$0xff] }
  0x30   :  { %1637 = vmatpush3.msra.mxu0 %v2088_v15  ;;  %1627 = vmatprep.subr.mxu1 %v2014_v0  ;;  %v2614_v41 = vand.u32 4294901760, %v699_v14 }
  0x31   :  { %1638 = vmatprep.subr.mxu0 %v2014_v0  ;;  %1628 = vmatpush3.msra.mxu1 %v240_v39  ;;  %v2612_v39 = vsub.f32 %v700_v58, %v2596_v7 }
  0x32   :  { %1639 = vmatpush3.msra.mxu0 %v2091_v16  ;;  %1629 = vmatprep.subr.mxu1 %v2014_v0 }
  0x33   :  { %1640 = vmatprep.subr.mxu0 %v2014_v0  ;;  %1630 = vmatpush3.msra.mxu1 %v247_v50 }
  0x34   :  { %1641 = vmatpush3.msra.mxu0 %v2096_v18  ;;  %1631 = vmatprep.subr.mxu1 %v2014_v0 }
  0x35   :  { %1642 = vmatprep.subr.mxu0 %v2014_v0  ;;  %1632 = vmatpush3.msra.mxu1 %v254_v51  ;;  %v698_v51 = vld [vmem:[%s2871_s3 + $0x18] sm:$0xff] }
  0x36   :  { %1643 = vmatpush3.msra.mxu0 %v2103_v20  ;;  %1634 = vmatmul.mubr.f32.vlgmr.msra.gmra.mxu1 %v2199_v62 }
  0x37   :  { %1644 = vmatprep.subr.mxu0 %v2014_v0  ;;  %1671 = vmatprep.subr.mxu1 %v2014_v0 }
  0x38   :  { %1645 = vmatpush3.msra.mxu0 %v2106_v21  ;;  %1672 = vmatpush3.msra.mxu1 %v2059_v4 }
  0x39   :  { %1646 = vmatprep.subr.mxu0 %v2014_v0  ;;  %1673 = vmatprep.subr.mxu1 %v2014_v0 }
  0x3a   :  { %1647 = vmatpush3.msra.mxu0 %v2123_v30  ;;  %1674 = vmatpush3.msra.mxu1 %v2061_v5 }
  0x3b   :  { %1648 = vmatprep.subr.mxu0 %v2014_v0  ;;  %1675 = vmatprep.subr.mxu1 %v2014_v0 }
  0x3c   :  { %1649 = vmatpush3.msra.mxu0 %v2136_v34  ;;  %1676 = vmatpush3.msra.mxu1 %v2063_v6  ;;  %v706_v34 = vld [vmem:[%s2871_s3 + $0x58] sm:$0xff] }
  0x3d   :  { %1650 = vmatprep.subr.mxu0 %v2014_v0  ;;  %1677 = vmatprep.subr.mxu1 %v2014_v0 }
  0x3e   :  { %1651 = vmatpush3.msra.mxu0 %v2157_v43  ;;  %1678 = vmatpush3.msra.mxu1 %v2074_v10  ;;  %v705_v43 = vld [vmem:[%s2871_s3 + $0x50] sm:$0xff] }
  0x3f   :  { %1652 = vmatprep.subr.mxu0 %v2014_v0  ;;  %1679 = vmatprep.subr.mxu1 %v2014_v0 }
  0x40   :  { %1653 = vmatpush3.msra.mxu0 %v2164_v47  ;;  %1680 = vmatpush3.msra.mxu1 %v2076_v11  ;;  %v2528_v47 = vand.u32 4294901760, %v705_v43 }
  0x41   :  { %1654 = vmatprep.subr.mxu0 %v2014_v0  ;;  %1681 = vmatprep.subr.mxu1 %v2014_v0 }
  0x42   :  { %1655 = vmatpush3.msra.mxu0 %v2182_v55  ;;  %1682 = vmatpush3.msra.mxu1 %v2078_v12 }
  0x43   :  { %1656 = vmatprep.subr.mxu0 %v2014_v0  ;;  %1683 = vmatprep.subr.mxu1 %v2014_v0 }
  0x44   :  { %1657 = vmatpush3.msra.mxu0 %v2197_v61  ;;  %1684 = vmatpush3.msra.mxu1 %v2093_v17  ;;  %v703_v61 = vld [vmem:[%s2871_s3 + $0x40] sm:$0xff] }
  0x45   :  { %1658 = vmatprep.subr.mxu0 %v2014_v0  ;;  %1685 = vmatprep.subr.mxu1 %v2014_v0 }
  0x46   :  { %1659 = vmatpush3.msra.mxu0 %v2214_v8  ;;  %1686 = vmatpush3.msra.mxu1 %v2112_v25 }
  0x47   :  { %1660 = vmatprep.subr.mxu0 %v2014_v0  ;;  %1687 = vmatprep.subr.mxu1 %v2014_v0 }
  0x48   :  { %1661 = vmatpush3.msra.mxu0 %v2229_v31  ;;  %1688 = vmatpush3.msra.mxu1 %v2119_v28 }
  0x49   :  { %1662 = vmatprep.subr.mxu0 %v2014_v0  ;;  %1689 = vmatprep.subr.mxu1 %v2014_v0 }
  0x4a   :  { %1663 = vmatpush3.msra.mxu0 %v2241_v38  ;;  %1690 = vmatpush3.msra.mxu1 %v2139_v35 }
  0x4b   :  { %1664 = vmatprep.subr.mxu0 %v2014_v0  ;;  %1691 = vmatprep.subr.mxu1 %v2014_v0 }
  0x4c   :  { %1665 = vmatpush3.msra.mxu0 %v2252_v49  ;;  %1692 = vmatpush3.msra.mxu1 %v2160_v45 }
  0x4d   :  { %1666 = vmatprep.subr.mxu0 %v2014_v0  ;;  %1693 = vmatprep.subr.mxu1 %v2014_v0 }
  0x4e   :  { %1667 = vmatpush3.msra.mxu0 %v2262_v54  ;;  %1668 = vmatprep.mubr.msk.f32.mxu0 %vm2015_vm0, %v2014_v0 }
  0x4f   :  { %1694 = vmatpush3.msra.mxu1 %v2168_v48  ;;  %1669 = vmatmul.mubr.f32.vlgmr.msra.gmra.mxu0 %v2226_v26 }
  0x50   :  { %1695 = vmatprep.subr.mxu1 %v2014_v0  ;;  %1706 = vmatprep.subr.mxu0 %v2014_v0 }
  0x51   :  { %1696 = vmatpush3.msra.mxu1 %v2191_v59  ;;  %1707 = vmatpush3.msra.mxu0 %v147_v22 }
  0x52   :  { %1697 = vmatprep.subr.mxu1 %v2014_v0  ;;  %1708 = vmatprep.subr.mxu0 %v2014_v0 }
  0x53   :  { %1698 = vmatpush3.msra.mxu1 %v2203_v63  ;;  %1709 = vmatpush3.msra.mxu0 %v154_v23 }
  0x54   :  { %1699 = vmatprep.subr.mxu1 %v2014_v0  ;;  %1710 = vmatprep.subr.mxu0 %v2014_v0 }
  0x55   :  { %1700 = vmatpush3.msra.mxu1 %v2221_v13  ;;  %1711 = vmatpush3.msra.mxu0 %v161_v24 }
  0x56   :  { %1701 = vmatprep.subr.mxu1 %v2014_v0  ;;  %1712 = vmatprep.subr.mxu0 %v2014_v0 }
  0x57   :  { %1702 = vmatpush3.msra.mxu1 %v2233_v32  ;;  %1703 = vmatprep.mubr.msk.f32.mxu1 %vm2015_vm0, %v2014_v0 }
  0x58   :  { %1713 = vmatpush3.msra.mxu0 %v168_v27  ;;  %1704 = vmatmul.mubr.f32.vlgmr.msra.gmra.mxu1 %v136_v42  ;;  %v701_v42 = vld [vmem:[%s2871_s3 + $0x30] sm:$0xff] }
  0x59   :  { %1714 = vmatprep.subr.mxu0 %v2014_v0  ;;  %1741 = vmatprep.subr.mxu1 %v2014_v0  ;;  %v2583_v54 = vand.u32 4294901760, %v701_v42 }
  0x5a   :  { %1715 = vmatpush3.msra.mxu0 %v175_v29  ;;  %1742 = vmatpush3.msra.mxu1 %v2059_v4  ;;  %v710_v4 = vld [vmem:[%s2871_s3 + $0x78] sm:$0xff]  ;;  %v707_v29 = vld [vmem:[%s2871_s3 + $0x60] sm:$0xff] }
  0x5b   :  { %1716 = vmatprep.subr.mxu0 %v2014_v0  ;;  %1743 = vmatprep.subr.mxu1 %v2014_v0  ;;  %v2508_v30 = vand.u32 4294901760, %v707_v29  ;;  %v2594_v2 = vsub.f32 %v701_v42, %v2583_v54 }
  0x5c   :  { %1717 = vmatpush3.msra.mxu0 %v182_v40  ;;  %1744 = vmatpush3.msra.mxu1 %v2061_v5  ;;  %v709_v5 = vld [vmem:[%s2871_s3 + $0x70] sm:$0xff]  ;;  %v2517_v40 = vand.u32 4294901760, %v706_v34 }
  0x5d   :  { %1718 = vmatprep.subr.mxu0 %v2014_v0  ;;  %1745 = vmatprep.subr.mxu1 %v2014_v0  ;;  %v868_v36 = vand.u32 4294901760, %v2594_v2 }
  0x5e   :  { %1719 = vmatpush3.msra.mxu0 %v189_v46  ;;  %1746 = vmatpush3.msra.mxu1 %v2063_v6  ;;  %v708_v6 = vld [vmem:[%s2871_s3 + $0x68] sm:$0xff]  ;;  %v2526_v46 = vsub.f32 %v706_v34, %v2517_v40 }
  0x5f   :  { %1720 = vmatprep.subr.mxu0 %v2014_v0  ;;  %1747 = vmatprep.subr.mxu1 %v2014_v0  ;;  %v696_v34 = vld [vmem:[%s2871_s3 + $0x8] sm:$0xff] }
  0x60   :  { %1721 = vmatpush3.msra.mxu0 %v196_v53  ;;  %1748 = vmatpush3.msra.mxu1 %v2074_v10  ;;  %v2470_v10 = vand.u32 4294901760, %v710_v4  ;;  %v833_v55 = vand.u32 4294901760, %v2526_v46 }
  0x61   :  { %1722 = vmatprep.subr.mxu0 %v2014_v0  ;;  %1749 = vmatprep.subr.mxu1 %v2014_v0 }
  0x62   :  { %1723 = vmatpush3.msra.mxu0 %v203_v57  ;;  %1750 = vmatpush3.msra.mxu1 %v2076_v11  ;;  %v2472_v11 = vand.u32 4294901760, %v709_v5  ;;  %v2477_v15 = vsub.f32 %v710_v4, %v2470_v10  ;;  %v2540_v57 = vsub.f32 %v705_v43, %v2528_v47  ;;  %v695_v43 = vld [vmem:[%s2871_s3] sm:$0xff] }
  0x63   :  { %1724 = vmatprep.subr.mxu0 %v2014_v0  ;;  %1751 = vmatprep.subr.mxu1 %v2014_v0 }
  0x64   :  { %1725 = vmatpush3.msra.mxu0 %v210_v3  ;;  %1752 = vmatpush3.msra.mxu1 %v2078_v12  ;;  %v2474_v12 = vand.u32 4294901760, %v708_v6  ;;  %v2480_v16 = vsub.f32 %v709_v5, %v2472_v11  ;;  %v805_v18 = vand.u32 4294901760, %v2477_v15  ;;  %v840_v3 = vand.u32 4294901760, %v2540_v57 }
  0x65   :  { %1726 = vmatprep.subr.mxu0 %v2014_v0  ;;  %1753 = vmatprep.subr.mxu1 %v2014_v0  ;;  %v869_v5 = vsub.f32 %v2594_v2, %v868_v36 }
  0x66   :  { %1727 = vmatpush3.msra.mxu0 %v217_v19  ;;  %1754 = vmatpush3.msra.mxu1 %v2093_v17  ;;  %v2483_v17 = vsub.f32 %v708_v6, %v2474_v12  ;;  %v812_v20 = vand.u32 4294901760, %v2480_v16  ;;  %v806_v22 = vsub.f32 %v2477_v15, %v805_v18  ;;  %v702_v19 = vld [vmem:[%s2871_s3 + $0x38] sm:$0xff]  ;;  %v841_v31 = vsub.f32 %v2540_v57, %v840_v3 }
  0x67   :  { %1728 = vmatprep.subr.mxu0 %v2014_v0  ;;  %1755 = vmatprep.subr.mxu1 %v2014_v0  ;;  %v875_v6 = vand.u32 4294901760, %v2612_v39 }
  0x68   :  { %1729 = vmatpush3.msra.mxu0 %v224_v37  ;;  %1756 = vmatpush3.msra.mxu1 %v2112_v25  ;;  %v819_v21 = vand.u32 4294901760, %v2483_v17  ;;  %v813_v23 = vsub.f32 %v2480_v16, %v812_v20  ;;  %v807_v25 = vand.u32 4294901760, %v806_v22  ;;  %v2567_v37 = vand.u32 4294901760, %v702_v19 }
  0x69   :  { %1730 = vmatprep.subr.mxu0 %v2014_v0  ;;  %1757 = vmatprep.subr.mxu1 %v2014_v0  ;;  %v2627_v22 = vsub.f32 %v699_v14, %v2614_v41 }
  0x6a   :  { %1731 = vmatpush3.msra.mxu0 %v231_v44  ;;  %1758 = vmatpush3.msra.mxu1 %v2119_v28  ;;  %v820_v24 = vsub.f32 %v2483_v17, %v819_v21  ;;  %v814_v27 = vand.u32 4294901760, %v813_v23  ;;  %v842_v44 = vand.u32 4294901760, %v841_v31  ;;  %v2630_v23 = vand.u32 4294901760, %v698_v51 }
  0x6b   :  { %1732 = vmatprep.subr.mxu0 %v2014_v0  ;;  %1759 = vmatprep.subr.mxu1 %v2014_v0 }
  0x6c   :  { %1733 = vmatpush3.msra.mxu0 %v238_v52  ;;  %1760 = vmatpush3.msra.mxu1 %v2139_v35  ;;  %v821_v28 = vand.u32 4294901760, %v820_v24  ;;  %v2515_v35 = vsub.f32 %v707_v29, %v2508_v30  ;;  %v2581_v52 = vsub.f32 %v702_v19, %v2567_v37  ;;  %v697_v24 = vld [vmem:[%s2871_s3 + $0x10] sm:$0xff] }
  0x6d   :  { %1734 = vmatprep.subr.mxu0 %v2014_v0  ;;  %1761 = vmatprep.subr.mxu1 %v2014_v0  ;;  %v2641_v29 = vand.u32 4294901760, %v697_v24 }
  0x6e   :  { %1735 = vmatpush3.msra.mxu0 %v245_v1  ;;  %1762 = vmatpush3.msra.mxu1 %v2160_v45  ;;  %v826_v45 = vand.u32 4294901760, %v2515_v35  ;;  %v861_v1 = vand.u32 4294901760, %v2581_v52 }
  0x6f   :  { %1736 = vmatprep.subr.mxu0 %v2014_v0  ;;  %1763 = vmatprep.subr.mxu1 %v2014_v0  ;;  %v2663_v19 = vsub.f32 %v697_v24, %v2641_v29 }
  0x70   :  { %1737 = vmatpush3.msra.mxu0 %v252_v9  ;;  %1738 = vmatprep.mubr.msk.f32.mxu0 %vm2015_vm0, %v2014_v0  ;;  %v827_v53 = vsub.f32 %v2515_v35, %v826_v45  ;;  %v862_v33 = vsub.f32 %v2581_v52, %v861_v1 }
  0x71   :  { %1764 = vmatpush3.msra.mxu1 %v2168_v48  ;;  %1739 = vmatmul.mubr.f32.vlgmr.msra.gmra.mxu0 %v2199_v62  ;;  %v704_v48 = vld [vmem:[%s2871_s3 + $0x48] sm:$0xff] }
  0x72   :  { %1765 = vmatprep.subr.mxu1 %v2014_v0  ;;  %1773 = vmatprep.mubr.msk.f32.mxu1 %vm2015_vm0, %v2014_v0  ;;  %v863_v4 = vand.u32 4294901760, %v862_v33 }
  0x73   :  { %1766 = vmatpush3.msra.mxu1 %v2191_v59  ;;  %1776 = vmatprep.subr.mxu0 %v2014_v0  ;;  %v2542_v59 = vand.u32 4294901760, %v704_v48 }
  0x74   :  { %1767 = vmatprep.subr.mxu1 %v2014_v0  ;;  %1808 = vmatprep.mubr.msk.f32.mxu0 %vm2015_vm0, %v2014_v0 }
  0x75   :  { %1768 = vmatpush3.msra.mxu1 %v2203_v63  ;;  %1777 = vmatpush3.msra.mxu0 %v2470_v10  ;;  %v834_v63 = vsub.f32 %v2526_v46, %v833_v55  ;;  %v2554_v8 = vsub.f32 %v704_v48, %v2542_v59  ;;  %v2651_v48 = vsub.f32 %v698_v51, %v2630_v23 }
  0x76   :  { %1769 = vmatprep.subr.mxu1 %v2014_v0  ;;  %1778 = vmatprep.subr.mxu0 %v2014_v0 }
  0x77   :  { %1770 = vmatpush3.msra.mxu1 %v2221_v13  ;;  %1779 = vmatpush3.msra.mxu0 %v2472_v11  ;;  %v2557_v13 = vand.u32 4294901760, %v703_v61  ;;  %v835_v26 = vand.u32 4294901760, %v834_v63 }
  0x78   :  { %1771 = vmatprep.subr.mxu1 %v2014_v0  ;;  %1780 = vmatprep.subr.mxu0 %v2014_v0 }
  0x79   :  { %1772 = vmatpush3.msra.mxu1 %v2233_v32  ;;  %1781 = vmatpush3.msra.mxu0 %v2474_v12  ;;  %v847_v32 = vand.u32 4294901760, %v2554_v8  ;;  %v2571_v38 = vsub.f32 %v703_v61, %v2557_v13  ;;  %v2655_v61 = vand.u32 4294901760, %v695_v43 }
  0x7a   :  { %1774 = vmatmul.mubr.f32.vlgmr.msra.gmra.mxu1 %v2199_v62  ;;  %1811 = vmatprep.subr.mxu1 %v2014_v0  ;;  %v828_v62 = vand.u32 4294901760, %v827_v53  ;;  %v2653_v53 = vand.u32 4294901760, %v696_v34 }
  0x7b   :  { %1843 = vmatprep.mubr.msk.f32.mxu1 %vm2015_vm0, %v2014_v0  ;;  %1782 = vmatprep.subr.mxu0 %v2014_v0  ;;  %v848_v49 = vsub.f32 %v2554_v8, %v847_v32  ;;  %v854_v56 = vand.u32 4294901760, %v2571_v38  ;;  %v2671_v42 = vsub.f32 %v695_v43, %v2655_v61 }
  0x7c   :  { %1812 = vmatpush3.msra.mxu1 %v807_v25  ;;  %1783 = vmatpush3.msra.mxu0 %v2508_v30  ;;  %v870_v25 = vand.u32 4294901760, %v869_v5  ;;  %v2668_v31 = vsub.f32 %v696_v34, %v2653_v53 }
  0x7d   :  { %1813 = vmatprep.subr.mxu1 %v2014_v0  ;;  %1784 = vmatprep.subr.mxu0 %v2014_v0  ;;  %v849_v60 = vand.u32 4294901760, %v848_v49  ;;  %v855_v9 = vsub.f32 %v2571_v38, %v854_v56  ;;  %v2875_v49 = vand.u32 4294901760, %v2663_v19 }
  0x7e   :  { %1814 = vmatpush3.msra.mxu1 %v814_v27  ;;  %1785 = vmatpush3.msra.mxu0 %v2517_v40  ;;  %v876_v27 = vsub.f32 %v2612_v39, %v875_v6 }
  0x7f   :  { %1815 = vmatprep.subr.mxu1 %v2014_v0  ;;  %1786 = vmatprep.subr.mxu0 %v2014_v0  ;;  %v856_v50 = vand.u32 4294901760, %v855_v9  ;;  %v2873_v9 = vand.u32 4294901760, %v2671_v42  ;;  %v897_v14 = vsub.f32 %v2663_v19, %v2875_v49 }
  0x80   :  { %1816 = vmatpush3.msra.mxu1 %v821_v28  ;;  %1787 = vmatpush3.msra.mxu0 %v2528_v47  ;;  %v882_v28 = vand.u32 4294901760, %v2627_v22 }
  0x81   :  { %1817 = vmatprep.subr.mxu1 %v2014_v0  ;;  %1788 = vmatprep.subr.mxu0 %v2014_v0  ;;  %v911_v51 = vsub.f32 %v2671_v42, %v2873_v9 }
  0x82   :  { %1789 = vmatpush3.msra.mxu0 %v2542_v59  ;;  %1818 = vmatpush3.msra.mxu1 %v828_v62  ;;  %v877_v62 = vand.u32 4294901760, %v876_v27  ;;  %v883_v63 = vsub.f32 %v2627_v22, %v882_v28 }
  0x83   :  { %1790 = vmatprep.subr.mxu0 %v2014_v0  ;;  %1819 = vmatprep.subr.mxu1 %v2014_v0  ;;  %v912_v24 = vand.u32 4294901760, %v911_v51 }
  0x84   :  { %1791 = vmatpush3.msra.mxu0 %v2557_v13  ;;  %1820 = vmatpush3.msra.mxu1 %v835_v26  ;;  %v2876_v26 = vand.u32 4294901760, %v2651_v48 }
  0x85   :  { %1792 = vmatprep.subr.mxu0 %v2014_v0  ;;  %1821 = vmatprep.subr.mxu1 %v2014_v0 }
  0x86   :  { %1793 = vmatpush3.msra.mxu0 %v2567_v37  ;;  %1822 = vmatpush3.msra.mxu1 %v842_v44  ;;  %v884_v44 = vand.u32 4294901760, %v883_v63  ;;  %v890_v58 = vsub.f32 %v2651_v48, %v2876_v26 }
  0x87   :  { %1794 = vmatprep.subr.mxu0 %v2014_v0  ;;  %1823 = vmatprep.subr.mxu1 %v2014_v0 }
  0x88   :  { %1795 = vmatpush3.msra.mxu0 %v2583_v54  ;;  %1824 = vmatpush3.msra.mxu1 %v849_v60  ;;  %v2874_v60 = vand.u32 4294901760, %v2668_v31  ;;  %v891_v33 = vand.u32 4294901760, %v890_v58 }
  0x89   :  { %1796 = vmatprep.subr.mxu0 %v2014_v0  ;;  %1825 = vmatprep.subr.mxu1 %v2014_v0 }
  0x8a   :  { %1797 = vmatpush3.msra.mxu0 %v2596_v7  ;;  %1826 = vmatpush3.msra.mxu1 %v856_v50  ;;  %v904_v50 = vsub.f32 %v2668_v31, %v2874_v60 }
  0x8b   :  { %1798 = vmatprep.subr.mxu0 %v2014_v0  ;;  %1827 = vmatprep.subr.mxu1 %v2014_v0 }
  0x8c   :  { %1799 = vmatpush3.msra.mxu0 %v2614_v41  ;;  %1828 = vmatpush3.msra.mxu1 %v863_v4  ;;  %v898_v4 = vand.u32 4294901760, %v897_v14  ;;  %v905_v5 = vand.u32 4294901760, %v904_v50  ;;  %v1361_v14 = vld [vmem:[%s2870_s2] ss:$0 sm:$0xff] }
  0x8d   :  { %1800 = vmatprep.subr.mxu0 %v2014_v0  ;;  %1829 = vmatprep.subr.mxu1 %v2014_v0 }
  0x8e   :  { %1801 = vmatpush3.msra.mxu0 %v2630_v23  ;;  %1830 = vmatpush3.msra.mxu1 %v870_v25 }
  0x8f   :  { %1802 = vmatprep.subr.mxu0 %v2014_v0  ;;  %1831 = vmatprep.subr.mxu1 %v2014_v0 }
  0x90   :  { %1803 = vmatpush3.msra.mxu0 %v2641_v29  ;;  %1832 = vmatpush3.msra.mxu1 %v877_v62 }
  0x91   :  { %1804 = vmatprep.subr.mxu0 %v2014_v0  ;;  %1833 = vmatprep.subr.mxu1 %v2014_v0 }
  0x92   :  { %1805 = vmatpush3.msra.mxu0 %v2653_v53  ;;  %1834 = vmatpush3.msra.mxu1 %v884_v44 }
  0x93   :  { %1806 = vmatprep.subr.mxu0 %v2014_v0  ;;  %1835 = vmatprep.subr.mxu1 %v2014_v0 }
  0x94   :  { %1807 = vmatpush3.msra.mxu0 %v2655_v61  ;;  %1836 = vmatpush3.msra.mxu1 %v891_v33 }
  0x95   :  { %1846 = vmatprep.subr.mxu0 %v2014_v0  ;;  %1837 = vmatprep.subr.mxu1 %v2014_v0 }
  0x96   :  { %1838 = vmatpush3.msra.mxu1 %v898_v4 }
  0x97   :  { %1839 = vmatprep.subr.mxu1 %v2014_v0 }
  0x98   :  { %1840 = vmatpush3.msra.mxu1 %v905_v5 }
  0x99   :  { %1841 = vmatprep.subr.mxu1 %v2014_v0 }
  0x9a   :  { %1842 = vmatpush3.msra.mxu1 %v912_v24 }
  0x9b   :  { %1881 = vmatprep.subr.mxu1 %v2014_v0 }
  0xef   :  { %v140_v25 = vpop.f32.mrf.mxu0 }
  0xf0   :  { %v141_v33 = vadd.f32 %v1361_v14, %v140_v25 }
  0xf1   :  { %v1600_v27 = vpop.f32.mrf.mxu0 }
  0xf6   :  { %v291_v34 = vpop.f32.mrf.mxu1 }
  0xf7   :  { %v292_v51 = vadd.f32 %v291_v34, %v141_v33 }
  0xf8   :  { %v1635_v43 = vpop.f32.mrf.mxu1 }
 0x10f   :  { %v395_v62 = vpop.f32.mrf.mxu0 }
 0x110   :  { %v396_v5 = vadd.f32 %v395_v62, %v292_v51 }
 0x111   :  { %v1670_v63 = vpop.f32.mrf.mxu0 }
 0x118   :  { %v484_v44 = vpop.f32.mrf.mxu1 }
 0x119   :  { %v485_v24 = vadd.f32 %v484_v44, %v396_v5 }
 0x11a   :  { %v1705_v58 = vpop.f32.mrf.mxu1 }
 0x131   :  { %v603_v50 = vpop.f32.mrf.mxu0 }
 0x132   :  { %v604_v9 = vadd.f32 %v603_v50, %v485_v24 }
 0x133   :  { %v1740_v4 = vpop.f32.mrf.mxu0 }
 0x13a   :  { %v690_v60 = vpop.f32.mrf.mxu1 }
 0x13b   :  { %v691_v49 = vadd.f32 %v690_v60, %v604_v9 }
 0x13c   :  { %v1775_v27 = vpop.f32.mrf.mxu1 }
 0x13d   :  { %1989 = vtanh.f32 %v691_v49 }
 0x14a   :  { %v1990_v43 = vpop.eup %1989 }
 0x14b   :  { %v2704_v26 = vand.u32 4294901760, %v1990_v43 }
 0x14d   :  { %1844 = vmatmul.mubr.f32.vlgmr.msra.gmra.mxu1 %v2704_v26  ;;  %v2708_v63 = vsub.f32 %v1990_v43, %v2704_v26 }
 0x14e   :  { %1882 = vmatpush3.msra.mxu1 %v2470_v10  ;;  %1913 = vmatprep.mubr.msk.f32.mxu1 %vm2015_vm0, %v2014_v0 }
 0x14f   :  { %1883 = vmatprep.subr.mxu1 %v2014_v0  ;;  %v794_v25 = vand.u32 4294901760, %v2708_v63 }
 0x150   :  { %1884 = vmatpush3.msra.mxu1 %v2472_v11 }
 0x151   :  { %1885 = vmatprep.subr.mxu1 %v2014_v0  ;;  %v795_v49 = vsub.f32 %v2708_v63, %v794_v25 }
 0x152   :  { %1886 = vmatpush3.msra.mxu1 %v2474_v12 }
 0x153   :  { %1887 = vmatprep.subr.mxu1 %v2014_v0  ;;  %v796_v60 = vand.u32 4294901760, %v795_v49 }
 0x154   :  { %1888 = vmatpush3.msra.mxu1 %v2508_v30 }
 0x155   :  { %1889 = vmatprep.subr.mxu1 %v2014_v0  ;;  %1809 = vmatmul.mubr.f32.vlgmr.msra.gmra.mxu0 %v796_v60 }
 0x156   :  { %1847 = vmatpush3.msra.mxu0 %v2477_v15  ;;  %1890 = vmatpush3.msra.mxu1 %v2517_v40  ;;  %v2880_v15 = vand.u32 4294901760, %v2671_v42 }
 0x157   :  { %1848 = vmatprep.subr.mxu0 %v2014_v0  ;;  %1891 = vmatprep.subr.mxu1 %v2014_v0 }
 0x158   :  { %1849 = vmatpush3.msra.mxu0 %v2480_v16  ;;  %1892 = vmatpush3.msra.mxu1 %v2528_v47 }
 0x159   :  { %1850 = vmatprep.subr.mxu0 %v2014_v0  ;;  %1893 = vmatprep.subr.mxu1 %v2014_v0 }
 0x15a   :  { %1851 = vmatpush3.msra.mxu0 %v2483_v17  ;;  %1894 = vmatpush3.msra.mxu1 %v2542_v59 }
 0x15b   :  { %1852 = vmatprep.subr.mxu0 %v2014_v0  ;;  %1895 = vmatprep.subr.mxu1 %v2014_v0 }
 0x15c   :  { %1853 = vmatpush3.msra.mxu0 %v2515_v35  ;;  %1896 = vmatpush3.msra.mxu1 %v2557_v13 }
 0x15d   :  { %1854 = vmatprep.subr.mxu0 %v2014_v0  ;;  %1897 = vmatprep.subr.mxu1 %v2014_v0 }
 0x15e   :  { %1855 = vmatpush3.msra.mxu0 %v2526_v46  ;;  %1898 = vmatpush3.msra.mxu1 %v2567_v37 }
 0x15f   :  { %1856 = vmatprep.subr.mxu0 %v2014_v0  ;;  %1899 = vmatprep.subr.mxu1 %v2014_v0 }
 0x160   :  { %1857 = vmatpush3.msra.mxu0 %v2540_v57  ;;  %1900 = vmatpush3.msra.mxu1 %v2583_v54 }
 0x161   :  { %1858 = vmatprep.subr.mxu0 %v2014_v0  ;;  %1901 = vmatprep.subr.mxu1 %v2014_v0 }
 0x162   :  { %1859 = vmatpush3.msra.mxu0 %v2554_v8  ;;  %1902 = vmatpush3.msra.mxu1 %v2596_v7 }
 0x163   :  { %1860 = vmatprep.subr.mxu0 %v2014_v0  ;;  %1903 = vmatprep.subr.mxu1 %v2014_v0 }
 0x164   :  { %1861 = vmatpush3.msra.mxu0 %v2571_v38  ;;  %1904 = vmatpush3.msra.mxu1 %v2614_v41 }
 0x165   :  { %1862 = vmatprep.subr.mxu0 %v2014_v0  ;;  %1905 = vmatprep.subr.mxu1 %v2014_v0 }
 0x166   :  { %1863 = vmatpush3.msra.mxu0 %v2581_v52  ;;  %1906 = vmatpush3.msra.mxu1 %v2630_v23 }
 0x167   :  { %1864 = vmatprep.subr.mxu0 %v2014_v0  ;;  %1907 = vmatprep.subr.mxu1 %v2014_v0 }
 0x168   :  { %1865 = vmatpush3.msra.mxu0 %v2594_v2  ;;  %1908 = vmatpush3.msra.mxu1 %v2641_v29 }
 0x169   :  { %1866 = vmatprep.subr.mxu0 %v2014_v0  ;;  %1909 = vmatprep.subr.mxu1 %v2014_v0 }
 0x16a   :  { %1867 = vmatpush3.msra.mxu0 %v2612_v39  ;;  %1910 = vmatpush3.msra.mxu1 %v2653_v53 }
 0x16b   :  { %1868 = vmatprep.subr.mxu0 %v2014_v0  ;;  %1911 = vmatprep.subr.mxu1 %v2014_v0 }
 0x16c   :  { %1869 = vmatpush3.msra.mxu0 %v2627_v22  ;;  %1912 = vmatpush3.msra.mxu1 %v2655_v61 }
 0x16d   :  { %1870 = vmatprep.subr.mxu0 %v2014_v0  ;;  %1914 = vmatmul.mubr.f32.vlgmr.msra.gmra.mxu1 %v794_v25 }
 0x16e   :  { %1951 = vmatprep.subr.mxu1 %v2014_v0  ;;  %1871 = vmatpush3.msra.mxu0 %v2651_v48 }
 0x16f   :  { %1952 = vmatpush3.msra.mxu1 %v2470_v10  ;;  %1872 = vmatprep.subr.mxu0 %v2014_v0  ;;  %v2877_v10 = vand.u32 4294901760, %v2651_v48 }
 0x170   :  { %1953 = vmatprep.subr.mxu1 %v2014_v0  ;;  %1873 = vmatpush3.msra.mxu0 %v2663_v19 }
 0x171   :  { %1954 = vmatpush3.msra.mxu1 %v2472_v11  ;;  %1874 = vmatprep.subr.mxu0 %v2014_v0  ;;  %v2878_v11 = vand.u32 4294901760, %v2663_v19 }
 0x172   :  { %1955 = vmatprep.subr.mxu1 %v2014_v0  ;;  %1875 = vmatpush3.msra.mxu0 %v2668_v31 }
 0x173   :  { %1956 = vmatpush3.msra.mxu1 %v2474_v12  ;;  %1876 = vmatprep.subr.mxu0 %v2014_v0  ;;  %v2879_v12 = vand.u32 4294901760, %v2668_v31 }
 0x174   :  { %1957 = vmatprep.subr.mxu1 %v2014_v0  ;;  %1877 = vmatpush3.msra.mxu0 %v2671_v42 }
 0x175   :  { %1878 = vmatprep.mubr.msk.f32.mxu0 %vm2015_vm0, %v2014_v0  ;;  %1958 = vmatpush3.msra.mxu1 %v2508_v30 }
 0x176   :  { %1879 = vmatmul.mubr.f32.vlgmr.msra.gmra.mxu0 %v2708_v63  ;;  %1916 = vmatprep.subr.mxu0 %v2014_v0 }
 0x177   :  { %1959 = vmatprep.subr.mxu1 %v2014_v0  ;;  %1917 = vmatpush3.msra.mxu0 %v805_v18 }
 0x178   :  { %1960 = vmatpush3.msra.mxu1 %v2517_v40  ;;  %1918 = vmatprep.subr.mxu0 %v2014_v0 }
 0x179   :  { %1961 = vmatprep.subr.mxu1 %v2014_v0  ;;  %1919 = vmatpush3.msra.mxu0 %v812_v20 }
 0x17a   :  { %1962 = vmatpush3.msra.mxu1 %v2528_v47  ;;  %1920 = vmatprep.subr.mxu0 %v2014_v0 }
 0x17b   :  { %1963 = vmatprep.subr.mxu1 %v2014_v0  ;;  %1921 = vmatpush3.msra.mxu0 %v819_v21 }
 0x17c   :  { %1964 = vmatpush3.msra.mxu1 %v2542_v59  ;;  %1922 = vmatprep.subr.mxu0 %v2014_v0 }
 0x17d   :  { %1965 = vmatprep.subr.mxu1 %v2014_v0  ;;  %1923 = vmatpush3.msra.mxu0 %v826_v45 }
 0x17e   :  { %1966 = vmatpush3.msra.mxu1 %v2557_v13  ;;  %1924 = vmatprep.subr.mxu0 %v2014_v0 }
 0x17f   :  { %1967 = vmatprep.subr.mxu1 %v2014_v0  ;;  %1925 = vmatpush3.msra.mxu0 %v833_v55 }
 0x180   :  { %1968 = vmatpush3.msra.mxu1 %v2567_v37  ;;  %1926 = vmatprep.subr.mxu0 %v2014_v0 }
 0x181   :  { %1969 = vmatprep.subr.mxu1 %v2014_v0  ;;  %1927 = vmatpush3.msra.mxu0 %v840_v3 }
 0x182   :  { %1970 = vmatpush3.msra.mxu1 %v2583_v54  ;;  %1928 = vmatprep.subr.mxu0 %v2014_v0 }
 0x183   :  { %1971 = vmatprep.subr.mxu1 %v2014_v0  ;;  %1929 = vmatpush3.msra.mxu0 %v847_v32 }
 0x184   :  { %1972 = vmatpush3.msra.mxu1 %v2596_v7  ;;  %1930 = vmatprep.subr.mxu0 %v2014_v0 }
 0x185   :  { %1973 = vmatprep.subr.mxu1 %v2014_v0  ;;  %1931 = vmatpush3.msra.mxu0 %v854_v56 }
 0x186   :  { %1974 = vmatpush3.msra.mxu1 %v2614_v41  ;;  %1932 = vmatprep.subr.mxu0 %v2014_v0 }
 0x187   :  { %1975 = vmatprep.subr.mxu1 %v2014_v0  ;;  %1933 = vmatpush3.msra.mxu0 %v861_v1 }
 0x188   :  { %1976 = vmatpush3.msra.mxu1 %v2630_v23  ;;  %1934 = vmatprep.subr.mxu0 %v2014_v0 }
 0x189   :  { %1977 = vmatprep.subr.mxu1 %v2014_v0  ;;  %1935 = vmatpush3.msra.mxu0 %v868_v36 }
 0x18a   :  { %1978 = vmatpush3.msra.mxu1 %v2641_v29  ;;  %1936 = vmatprep.subr.mxu0 %v2014_v0 }
 0x18b   :  { %1979 = vmatprep.subr.mxu1 %v2014_v0  ;;  %1937 = vmatpush3.msra.mxu0 %v875_v6 }
 0x18c   :  { %1980 = vmatpush3.msra.mxu1 %v2653_v53  ;;  %1938 = vmatprep.subr.mxu0 %v2014_v0 }
 0x18d   :  { %1981 = vmatprep.subr.mxu1 %v2014_v0  ;;  %1939 = vmatpush3.msra.mxu0 %v882_v28 }
 0x18e   :  { %1982 = vmatpush3.msra.mxu1 %v2655_v61  ;;  %1983 = vmatprep.mubr.msk.f32.mxu1 %vm2015_vm0, %v2014_v0 }
 0x18f   :  { %1940 = vmatprep.subr.mxu0 %v2014_v0  ;;  %1984 = vmatmul.mubr.f32.vlgmr.msra.gmra.mxu1 %v2704_v26 }
 0x190   :  { %1941 = vmatpush3.msra.mxu0 %v2877_v10  ;;  %1948 = vmatprep.mubr.msk.f32.mxu0 %vm2015_vm0, %v2014_v0 }
 0x191   :  { %1942 = vmatprep.subr.mxu0 %v2014_v0 }
 0x192   :  { %1943 = vmatpush3.msra.mxu0 %v2878_v11 }
 0x193   :  { %1944 = vmatprep.subr.mxu0 %v2014_v0 }
 0x194   :  { %1945 = vmatpush3.msra.mxu0 %v2879_v12 }
 0x195   :  { %1946 = vmatprep.subr.mxu0 %v2014_v0 }
 0x196   :  { %1947 = vmatpush3.msra.mxu0 %v2880_v15 }
 0x197   :  { %1949 = vmatmul.mubr.f32.vlgmr.msra.gmra.mxu0 %v2704_v26 }
 0x20d   :  { %v949_v16 = vpop.f32.mrf.mxu1 }
 0x20f   :  { %v1845_v17 = vpop.f32.mrf.mxu1 }
 0x215   :  { %v798_v18 = vpop.f32.mrf.mxu0 }
 0x216   :  { %v950_v46 = vadd.f32 %v949_v16, %v798_v18 }
 0x217   :  { %v1810_v20 = vpop.f32.mrf.mxu0 }
 0x22d   :  { %v1142_v21 = vpop.f32.mrf.mxu1 }
 0x22f   :  { %v1915_v30 = vpop.f32.mrf.mxu1 }
 0x236   :  { %v1053_v35 = vpop.f32.mrf.mxu0 }
 0x237   :  { %v1054_v55 = vadd.f32 %v1053_v35, %v950_v46 }
 0x238   :  { %v1880_v40 = vpop.f32.mrf.mxu0 }
 0x239   :  { %v1143_v57 = vadd.f32 %v1142_v21, %v1054_v55 }
 0x24f   :  { %v1348_v45 = vpop.f32.mrf.mxu1 }
 0x251   :  { %v1985_v47 = vpop.f32.mrf.mxu1 }
 0x257   :  { %v1261_v59 = vpop.f32.mrf.mxu0 }
 0x258   :  { %v1262_v0 = vadd.f32 %v1261_v59, %v1143_v57 }
 0x259   :  { %v1950_v3 = vpop.f32.mrf.mxu0 }
 0x25a   :  { %v1349_v8 = vadd.f32 %v1348_v45, %v1262_v0 }
 0x25c   :  { %v1352_v13 = vsub.f32 %v1349_v8, %v1349_v8 }
 0x25e   :  { %v1353_v32 = vadd.f32 1.0, %v1352_v13 }
 0x260   :  { %1355 = vst.msk [vmem:[%s2872_s4] sm:$0xff] %vm1354_vm1, %v1353_v32 }
 0x261   :  { %1360 = vsyncpa [#allocation3], 1 }

</bundles_post_ra>
